<compile_context>
chip_gen: v6e
topology: v6e:2x2x1
jax: 0.10.0
libtpu: 0.0.40
codegen_flags: <defaults>
</compile_context>

<pallas_src>
import functools
import math

import jax
import jax.numpy as jnp
from jax.experimental import pallas as pl
from jax.experimental.pallas import tpu as pltpu


def _masked_ce_kernel(logits_ref, target_ref, out_ref, *, num_tokens,
                      ignore_classes):
    """One (C, tile_s) class-major tile -> (8, 128) partial [loss_sum; count]."""
    s = pl.program_id(1)
    tile_s = target_ref.shape[-1]

    logits = logits_ref[...].astype(jnp.float32)             # (C, TS)
    tgt = target_ref[...]                                     # (1, TS) int32

    # Numerically-stable logsumexp over the class (sublane) axis.
    m = jnp.max(logits, axis=0, keepdims=True)                # (1, TS)
    lse = m + jnp.log(jnp.sum(jnp.exp(logits - m), axis=0, keepdims=True))

    # Gather-free target-logit selection: one-hot via iota compare + sum.
    class_ids = jax.lax.broadcasted_iota(jnp.int32, logits.shape, 0)
    tgt_logit = jnp.sum(jnp.where(class_ids == tgt, logits, 0.0),
                        axis=0, keepdims=True)

    ce = lse - tgt_logit                                       # (1, TS)

    # valid = token in bounds (ragged tail) and target not in ignore_classes.
    lane_ids = jax.lax.broadcasted_iota(jnp.int32, tgt.shape, 1)
    valid = (s * tile_s + lane_ids) < num_tokens
    for c in ignore_classes:
        valid = jnp.logical_and(valid, tgt != c)

    # where-select (not multiply) so garbage in out-of-bounds lanes cannot leak
    # NaN/Inf into the partial sums.
    loss_sum = jnp.sum(jnp.where(valid, ce, 0.0))
    cnt_sum = jnp.sum(valid.astype(jnp.float32))

    row = jax.lax.broadcasted_iota(jnp.int32, (8, 128), 0)
    out_ref[...] = jnp.where(row == 0, loss_sum,
                             jnp.where(row == 1, cnt_sum, 0.0))


def _vmem_capacity_bytes():
    try:
        return int(pltpu.get_tpu_info().vmem_capacity_bytes)
    except Exception:
        return 64 * 1024 * 1024   # conservative (v7x-sized) fallback


def custom_cross_entropy_loss(logits, target, ignore_classes):
    """logits: (B, C, *spatial); target: (B, *spatial) int; returns scalar f32."""
    B, C = logits.shape[0], logits.shape[1]
    S = int(math.prod(logits.shape[2:])) if logits.ndim > 2 else 1

    # Free reshapes (contiguous views): no transpose, no extra HBM traffic.
    logits3 = logits.reshape(B, C, S)
    target3 = target.reshape(B, 1, S).astype(jnp.int32)

    # Token-tile size from a generation-aware VMEM budget: ~2.5-4 MiB of logits
    # per step (double-buffered inputs + f32 intermediates stay well under the
    # scoped limit on every generation, including v7x's 64 MiB VMEM).
    itemsize = jnp.dtype(logits.dtype).itemsize
    vmem_cap = _vmem_capacity_bytes()
    logits_tile_budget = min(4 * 1024 * 1024, vmem_cap // 24)
    tn = max(128, (logits_tile_budget // (C * itemsize)) // 128 * 128)
    tile_s = S if tn >= S else tn            # full-dim tile is always legal
    num_tiles = -(-S // tile_s)
    grid = (B, num_tiles)

    kernel = functools.partial(
        _masked_ce_kernel,
        num_tokens=S,
        ignore_classes=tuple(int(c) for c in ignore_classes))

    out_bytes = B * num_tiles * 8 * 128 * 4
    cost = pl.CostEstimate(
        flops=int(5 * B * C * S),
        transcendentals=int(B * S * (C + 1)),
        bytes_accessed=int(logits3.size * itemsize + target3.size * 4 + out_bytes))

    partials = pl.pallas_call(
        kernel,
        out_shape=jax.ShapeDtypeStruct((B, num_tiles, 8, 128), jnp.float32),
        grid_spec=pltpu.PrefetchScalarGridSpec(
            num_scalar_prefetch=0,
            grid=grid,
            in_specs=[
                # class-major tile straight out of the natural (B, C, S) layout
                pl.BlockSpec((None, C, tile_s), lambda b, s: (b, 0, s)),
                pl.BlockSpec((None, 1, tile_s), lambda b, s: (b, 0, s)),
            ],
            out_specs=pl.BlockSpec((None, None, 8, 128),
                                   lambda b, s: (b, s, 0, 0)),
        ),
        compiler_params=pltpu.CompilerParams(
            dimension_semantics=("parallel", "parallel"),
            vmem_limit_bytes=vmem_cap // 2,
        ),
        cost_estimate=cost,
    )(logits3, target3)

    # Tiny final reduction in plain JAX (keeps both grid axes parallel-able).
    loss_sum = jnp.sum(partials[:, :, 0, 0])
    cnt_sum = jnp.sum(partials[:, :, 1, 0])
    return loss_sum / cnt_sum


def _custom_cross_entropy_loss_ref(logits, target, ignore_classes):
    """Pure-JAX reference mirroring the PyTorch module."""
    logp = jax.nn.log_softmax(logits.astype(jnp.float32), axis=1)
    nll = -jnp.take_along_axis(logp, target[:, None, ...], axis=1)[:, 0]
    mask = jnp.ones_like(target, dtype=bool)
    for c in ignore_classes:
        mask = mask & (target != c)
    maskf = mask.astype(jnp.float32)
    return jnp.sum(nll * maskf) / jnp.sum(maskf)


if __name__ == "__main__":
    key = jax.random.PRNGKey(0)
    k_logits, k_target = jax.random.split(key, 2)

    B, C, H, W = 2, 4, 16, 16
    ignore_classes = (0,)

    logits = jax.random.normal(k_logits, (B, C, H, W), dtype=jnp.float32)
    target = jax.random.randint(k_target, (B, H, W), 0, C, dtype=jnp.int32)

    loss = custom_cross_entropy_loss(logits, target, ignore_classes)
    loss = jax.block_until_ready(loss)

    ref = _custom_cross_entropy_loss_ref(logits, target, ignore_classes)
    assert jnp.allclose(loss, ref, rtol=1e-5, atol=1e-5), (loss, ref)

    print("KERNEL_OK")
</pallas_src>

<mosaic_0001>
module attributes {stable_mosaic.version = 11 : i64} {
  func.func @_masked_ce_kernel(%arg0: i32, %arg1: i32, %arg2: memref<1x4x256xf32, #tpu.memory_space<vmem>>, %arg3: memref<1x1x256xi32, #tpu.memory_space<vmem>>, %arg4: memref<1x1x8x128xf32, #tpu.memory_space<vmem>>) attributes {dimension_semantics = [#tpu.dimension_semantics<parallel>, #tpu.dimension_semantics<parallel>], iteration_bounds = array<i64: 2, 1>, scalar_prefetch = 0 : i64, scratch_operands = 0 : i64, tpu.core_type = #tpu.core_type<tc>, window_params = [{transform_indices = @transform_0, window_bounds = array<i64: 1, 4, 256>}, {transform_indices = @transform_1, window_bounds = array<i64: 1, 1, 256>}, {transform_indices = @transform_2, window_bounds = array<i64: 1, 1, 8, 128>}]} {
    %c0 = arith.constant 0 : index
    %c0_0 = arith.constant 0 : index
    %c0_1 = arith.constant 0 : index
    %0 = vector.load %arg2[%c0, %c0_0, %c0_1] : memref<1x4x256xf32, #tpu.memory_space<vmem>>, vector<1x4x256xf32>
    %1 = vector.shape_cast %0 : vector<1x4x256xf32> to vector<4x256xf32>
    %c0_2 = arith.constant 0 : index
    %c0_3 = arith.constant 0 : index
    %c0_4 = arith.constant 0 : index
    %2 = vector.load %arg3[%c0_2, %c0_3, %c0_4] : memref<1x1x256xi32, #tpu.memory_space<vmem>>, vector<1x1x256xi32>
    %3 = vector.shape_cast %2 : vector<1x1x256xi32> to vector<1x256xi32>
    %cst = arith.constant dense<0xFF800000> : vector<256xf32>
    %4 = vector.multi_reduction <maximumf>, %1, %cst [0] : vector<4x256xf32> to vector<256xf32>
    %5 = vector.shape_cast %4 : vector<256xf32> to vector<1x256xf32>
    %6 = vector.broadcast %5 : vector<1x256xf32> to vector<4x256xf32>
    %7 = arith.subf %1, %6 : vector<4x256xf32>
    %8 = math.exp %7 : vector<4x256xf32>
    %cst_5 = arith.constant dense<0.000000e+00> : vector<256xf32>
    %9 = vector.multi_reduction <add>, %8, %cst_5 [0] : vector<4x256xf32> to vector<256xf32>
    %10 = vector.shape_cast %9 : vector<256xf32> to vector<1x256xf32>
    %11 = math.log %10 : vector<1x256xf32>
    %12 = arith.addf %5, %11 : vector<1x256xf32>
    %13 = tpu.iota {dimensions = array<i32: 0>} : vector<4x256xi32>
    %14 = vector.broadcast %3 : vector<1x256xi32> to vector<4x256xi32>
    %15 = arith.cmpi eq, %13, %14 : vector<4x256xi32>
    %cst_6 = arith.constant 0.000000e+00 : f32
    %16 = vector.broadcast %cst_6 : f32 to vector<4x256xf32>
    %17 = arith.select %15, %1, %16 : vector<4x256xi1>, vector<4x256xf32>
    %cst_7 = arith.constant dense<0.000000e+00> : vector<256xf32>
    %18 = vector.multi_reduction <add>, %17, %cst_7 [0] : vector<4x256xf32> to vector<256xf32>
    %19 = vector.shape_cast %18 : vector<256xf32> to vector<1x256xf32>
    %20 = arith.subf %12, %19 : vector<1x256xf32>
    %21 = tpu.iota {dimensions = array<i32: 1>} : vector<1x256xi32>
    %c256_i32 = arith.constant 256 : i32
    %22 = arith.muli %arg1, %c256_i32 : i32
    %23 = vector.broadcast %22 : i32 to vector<1x256xi32>
    %24 = arith.addi %23, %21 : vector<1x256xi32>
    %c256_i32_8 = arith.constant 256 : i32
    %25 = vector.broadcast %c256_i32_8 : i32 to vector<1x256xi32>
    %26 = arith.cmpi slt, %24, %25 : vector<1x256xi32>
    %c0_i32 = arith.constant 0 : i32
    %27 = vector.broadcast %c0_i32 : i32 to vector<1x256xi32>
    %28 = arith.cmpi ne, %3, %27 : vector<1x256xi32>
    %29 = arith.andi %26, %28 : vector<1x256xi1>
    %cst_9 = arith.constant 0.000000e+00 : f32
    %30 = vector.broadcast %cst_9 : f32 to vector<1x256xf32>
    %31 = arith.select %29, %20, %30 : vector<1x256xi1>, vector<1x256xf32>
    %32 = vector.shape_cast %31 : vector<1x256xf32> to vector<1x1x256xf32>
    %cst_10 = arith.constant dense<0.000000e+00> : vector<1xf32>
    %33 = vector.multi_reduction <add>, %32, %cst_10 [1, 2] : vector<1x1x256xf32> to vector<1xf32>
    %34 = vector.shape_cast %33 : vector<1xf32> to vector<1x1x1xf32>
    %35 = vector.extract %34[0, 0, 0] : f32 from vector<1x1x1xf32>
    %36 = arith.extui %29 : vector<1x256xi1> to vector<1x256xi32>
    %37 = arith.sitofp %36 : vector<1x256xi32> to vector<1x256xf32>
    %38 = vector.shape_cast %37 : vector<1x256xf32> to vector<1x1x256xf32>
    %cst_11 = arith.constant dense<0.000000e+00> : vector<1xf32>
    %39 = vector.multi_reduction <add>, %38, %cst_11 [1, 2] : vector<1x1x256xf32> to vector<1xf32>
    %40 = vector.shape_cast %39 : vector<1xf32> to vector<1x1x1xf32>
    %41 = vector.extract %40[0, 0, 0] : f32 from vector<1x1x1xf32>
    %42 = tpu.iota {dimensions = array<i32: 0>} : vector<8x128xi32>
    %c0_i32_12 = arith.constant 0 : i32
    %43 = vector.broadcast %c0_i32_12 : i32 to vector<8x128xi32>
    %44 = arith.cmpi eq, %42, %43 : vector<8x128xi32>
    %c1_i32 = arith.constant 1 : i32
    %45 = vector.broadcast %c1_i32 : i32 to vector<8x128xi32>
    %46 = arith.cmpi eq, %42, %45 : vector<8x128xi32>
    %cst_13 = arith.constant 0.000000e+00 : f32
    %47 = vector.broadcast %41 : f32 to vector<8x128xf32>
    %48 = vector.broadcast %cst_13 : f32 to vector<8x128xf32>
    %49 = arith.select %46, %47, %48 : vector<8x128xi1>, vector<8x128xf32>
    %50 = vector.broadcast %35 : f32 to vector<8x128xf32>
    %51 = arith.select %44, %50, %49 : vector<8x128xi1>, vector<8x128xf32>
    %c0_14 = arith.constant 0 : index
    %c0_15 = arith.constant 0 : index
    %c0_16 = arith.constant 0 : index
    %c0_17 = arith.constant 0 : index
    %52 = vector.load %arg4[%c0_14, %c0_15, %c0_16, %c0_17] : memref<1x1x8x128xf32, #tpu.memory_space<vmem>>, vector<1x1x8x128xf32>
    %53 = vector.shape_cast %52 : vector<1x1x8x128xf32> to vector<8x128xf32>
    %54 = vector.shape_cast %51 : vector<8x128xf32> to vector<1x1x8x128xf32>
    tpu.vector_store %arg4[%c0_14, %c0_15, %c0_16, %c0_17], %54 {strides = array<i32>} : memref<1x1x8x128xf32, #tpu.memory_space<vmem>>, vector<1x1x8x128xf32>,
    return
  }
  func.func @transform_0(%arg0: i32, %arg1: i32) -> (i32, i32, i32) {
    %c0_i32 = arith.constant 0 : i32
    %c0_i32_0 = arith.constant 0 : i32
    return %arg0, %c0_i32, %arg1 : i32, i32, i32
  }
  func.func @transform_1(%arg0: i32, %arg1: i32) -> (i32, i32, i32) {
    %c0_i32 = arith.constant 0 : i32
    %c0_i32_0 = arith.constant 0 : i32
    return %arg0, %c0_i32, %arg1 : i32, i32, i32
  }
  func.func @transform_2(%arg0: i32, %arg1: i32) -> (i32, i32, i32, i32) {
    %c0_i32 = arith.constant 0 : i32
    %c0_i32_0 = arith.constant 0 : i32
    %c0_i32_1 = arith.constant 0 : i32
    return %arg0, %arg1, %c0_i32, %c0_i32_0 : i32, i32, i32, i32
  }
}

</mosaic_0001>

<bundles_post_ra>
// kernel: tpu_custom_call.1
= control target key start
LH: loop header
LB: loop body
LE: loop exit
PB: predicated region body
PF: predicated region fallthrough
CT: control target
= control target key end

     0   :  { %7 = vsyncpa [#allocation3], 0  ;;  %s938_s0 = inlined_call_operand.hbm [shape: f32[2,4,256], index: 0, kind: input, shape index: {}]   ;;  %s939_s1 = inlined_call_operand.hbm [shape: s32[2,1,256], index: 1, kind: input, shape index: {}]   ;;  %s940_s2 = inlined_call_operand.hbm [shape: f32[2,1,8,128], index: 2, kind: output, shape index: {}]  }
   0x1   :  { %9 = vsyncpa [#allocation3 + $0x1], 0 }
   0x2   :  { %10 = vsyncpa [#allocation6], 0 }
   0x3   :  { %12 = vsyncpa [#allocation6 + $0x1], 0 }
   0x4   :  { %13 = vsyncpa [#allocation4], 0 }
   0x5   :  { %15 = vsyncpa [#allocation4 + $0x1], 0  ;;  %s750_s9 = smov 0   ;;  %s752_s10 = smov 0  }
   0x6   :  { %s754_s11 = smov 0   ;;  %s756_s12 = smov 0  }
   0x7   :  { %s758_s13 = smov 0   ;;  %s760_s14 = smov 0  }
   0x8 LB: > { %s486_s15 = sadd.s32 4294967295, %s728_s14   ;;  %s487_s16 = sadd.s32 4294967294, %s728_s14   ;;  %s728_s14 = sphi %s760_s14, %s21_s14   ;;  %s724_s13 = sphi %s758_s13, %s952_s13   ;;  %s720_s12 = sphi %s756_s12, %s951_s12   ;;  %s716_s11 = sphi %s754_s11, %s950_s11   ;;  %s712_s10 = sphi %s752_s10, %s949_s10   ;;  %s708_s9 = sphi %s750_s9, %s948_s9  }
   0x9   : > { %s33_s17 = sadd.s32 1, %s724_s13  ;;  %s42_s18 = sadd.s32 1, %s716_s11 }
   0xa   : > { %p35_p0 = scmp.ge.s32.totalorder %s33_s17, 2  ;;  %p49_p1 = scmp.ne.s32.totalorder %s716_s11, %s712_s10 }
   0xb   : > { %p50_p2 = scmp.eq.s32.totalorder %s728_s14, 0  ;;  %p55_p3 = scmp.ne.s32.totalorder %s712_s10, %s708_s9 }
   0xc   : > { %s954_s17 = smov (%p35_p0, %s33_s17), 0  ;;  %p56_p5 = scmp.eq.s32.totalorder %s486_s15, 0 }
   0xd   : > { %p791_p4 = por %p50_p2, %p49_p1  ;;  %s37_s20 = ssub.s32 %s724_s13, %s954_s17 }
   0xe   : > { %p109_p6 = scmp.eq.s32.totalorder %s486_s15, 1  ;;  %p40_p7 = scmp.eq.s32.totalorder %s37_s20, 0 }
   0xf   : > { %p797_p8 = por %p56_p5, %p55_p3  ;;  %p115_p10 = scmp.eq.s32.totalorder %s487_s16, 1 }
  0x10   : > { %p801_p9 = por %p109_p6, %p49_p1  ;;  %p529_p13 = scmp.lt.s32.totalorder %s728_s14, 2 }
  0x11   : > { %s806_s23 = scalar_select %p40_p7, %s716_s11, %s42_s18  }
  0x12   : > { %p808_p11 = por %p115_p10, %p55_p3  ;;  %s815_s25 = sand.u32 1, %s716_s11  }
  0x13   : > { %s490_s26 = sshll.u32 %s815_s25, 3  ;;  %s506_s27 = sshll.u32 %s724_s13, 7 }
  0x14   : > { %s147_s30 = scalar_lea.hbm %s938_s0, %s506_s27  ;;  %s139_s3 = scalar_lea.vmem [#allocation2], %s490_s26 }
  0x15   : > { %s149_s4 = sshll.u32 %s139_s3, 4  ;;  %p824_p0 = pnand %p529_p13, %p791_p4  ;;  %s150_s4 = int_to_ptr.vmem [resolvable:$true] %s149_s4 }
  0x16   : > { %p496_p1 = scmp.ge.s32.totalorder %s728_s14, 1  ;;  %p175_p2 = scmp.lt.s32.totalorder %s728_s14, 3 }
  0x17   : > { %s136_s6 = scalar_lea.sflag [#allocation3], %s815_s25  ;;  %p590_p3 = pneg %p824_p0 }
  0x18   : > { %s601_s7 = scalar_lea.vmem %s150_s4, 128  ;;  %s730_s8 = smov [#allocation2]  }
  0x19   : > { %p602_p5 = scmp.ne.s32.totalorder %s150_s4, %s601_s7  ;;  %s606_s15 = sshll.u32 %s730_s8, 4  ;;  %s607_s15 = int_to_ptr.vmem [resolvable:$false] %s606_s15 }
  0x1a   : > { %s608_s16 = scalar_lea.vmem %s607_s15, 256  ;;  %p609_p4 = scmp.lt.s32.totalorder %s150_s4, %s607_s15 }
  0x1b   : > { %p604_p6 = pnand %p602_p5, %p590_p3  ;;  %p610_p10 = scmp.lt.s32.totalorder %s608_s16, %s601_s7 }
  0x1d   : > { %p605_p7 = pneg %p604_p6  ;;  %p611_p13 = por %p610_p10, %p609_p4 }
  0x1f   : > { %p612_p12 = pnand %p611_p13, %p605_p7 }
  0x21   : > { %615 = shalt.err (!%p612_p12)
}
  0x22   : > { %521 = dma.hbm_to_vmem [thread:$0]  (!%p824_p0), %s147_s30, 128, %s150_s4, %s136_s6  }
  0x23   : > { %p842_p5 = pnand %p496_p1, %p175_p2  ;;  %s493_s19 = sshll.u32 %s815_s25, 1 }
  0x24   : > { %s507_s20 = sshll.u32 %s724_s13, 5  ;;  %s160_s29 = scalar_lea.vmem [#allocation5], %s493_s19 }
  0x25   : > { %s168_s28 = scalar_lea.hbm %s939_s1, %s507_s20  ;;  %s170_s3 = sshll.u32 %s160_s29, 4  ;;  %s171_s3 = int_to_ptr.vmem [resolvable:$true] %s170_s3 }
  0x26   : > { %s157_s7 = scalar_lea.sflag [#allocation6], %s815_s25  ;;  %s629_s8 = scalar_lea.vmem %s171_s3, 32 }
  0x27   : > { %p630_p12 = scmp.ne.s32.totalorder %s171_s3, %s629_s8  ;;  %s731_s30 = smov [#allocation5]  }
  0x28   : > { %s634_s4 = sshll.u32 %s731_s30, 4  ;;  %s635_s4 = int_to_ptr.vmem [resolvable:$false] %s634_s4 }
  0x29   : > { %p632_p6 = pnand %p630_p12, %p590_p3  ;;  %s636_s6 = scalar_lea.vmem %s635_s4, 64 }
  0x2a   : > { %p637_p1 = scmp.lt.s32.totalorder %s171_s3, %s635_s4  ;;  %p638_p2 = scmp.lt.s32.totalorder %s636_s6, %s629_s8 }
  0x2b   : > { %p633_p7 = pneg %p632_p6 }
  0x2c   : > { %p639_p4 = por %p638_p2, %p637_p1 }
  0x2e   : > { %p640_p10 = pnand %p639_p4, %p633_p7 }
  0x30   : > { %643 = shalt.err (!%p640_p10)
}
  0x31   : > { %524 = dma.hbm_to_vmem [thread:$0]  (!%p824_p0), %s168_s28, 32, %s171_s3, %s157_s7  }
  0x32   : > { %179 = sbr.rel (%p842_p5) target bundleno = 354 (0x162), region = 28  ;;  %s860_s25 = sand.u32 (!%p842_p5), 1, %s712_s10  }
  0x33   : > { %s497_s15 = sshll.u32 (!%p842_p5), %s860_s25, 3  ;;  %s182_s16 = scalar_lea.sflag (!%p842_p5), [#allocation3], %s860_s25 }
  0x34   : > { %s185_s19 = scalar_lea.vmem (!%p842_p5), [#allocation2], %s497_s15 }
  0x37   : > { %695 = dma.done.wait (%p797_p8), %s182_s16, 128  }
  0x38   : > { %697 = vsyncadd (%p797_p8), %s182_s16, 4294967168  ;;  %s498_s5 = sshll.u32 %s860_s25, 1  ;;  %s191_s18 = scalar_lea.sflag [#allocation6], %s860_s25 }
  0x39   : > { %s194_s20 = scalar_lea.vmem [#allocation5], %s498_s5 }
  0x3a   : > { %699 = dma.done.wait (%p797_p8), %s191_s18, 32  }
  0x3b   : > { %701 = vsyncadd (%p797_p8), %s191_s18, 4294967264  ;;  %vm227_vm0 = vcmask 1043456   ;;  %v222_v0 = vld [vmem:[%s185_s19] sm:$0xff]  ;;  %v272_v18 = vlaneseq  ;;  %v223_v22 = vld [vmem:[%s194_s20] sm:$0x3]  ;;  %v732_v55 = vmov 0  }
  0x3c   : > { %v225_v1 = vcombine.high %v222_v0, %v222_v0  ;;  %v228_v2 = vsel %vm227_vm0, %v222_v0, -inf  ;;  %vm311_vm3 = vcmp.ne.s32.totalorder %v223_v22, 0  ;;  %vm327_vm5 = vcmask 1040384   ;;  %s503_s21 = sshll.u32 %s720_s12, 7  ;;  %s219_s27 = scalar_lea.vmem [#allocation7], %s497_s15 }
  0x3d   : > { %v229_v3 = vrot.slane %v228_v2, 4  ;;  %v878_v20 = vshrl.u32 %v272_v18, 7  ;;  %v312_v56 = vsel %vm311_vm3, 1, %v732_v55  ;;  %s378_s28 = sshll.u32 %s219_s27, 4  ;;  %s896_s8 = scalar_lea.hbm %s940_s2, %s503_s21  ;;  %s379_s28 = int_to_ptr.vmem [resolvable:$true] %s378_s28 }
  0x3e   : > { %v235_v4 = vsel %vm227_vm0, %v225_v1, -inf  ;;  %s364_s12 = scalar_lea.sflag [#allocation4], %s860_s25  ;;  %s644_s30 = scalar_lea.vmem %s379_s28, 128 }
  0x3f   : > { %v230_v5 = vmax.f32 %v228_v2, %v229_v3  ;;  %v236_v6 = vrot.slane %v235_v4, 4  ;;  %v276_v21 = vsub.s32 0, %v878_v20  ;;  %v280_v23 = vsub.s32 1, %v878_v20  ;;  %p645_p8 = scmp.ne.s32.totalorder %s379_s28, %s644_s30  ;;  %s734_s4 = smov [#allocation7]  }
  0x40   : > { %vm357_vm7 = vcmp.eq.s32.totalorder %v878_v20, 1  ;;  %vm356_vm8 = vcmp.eq.s32.totalorder %v878_v20, 0  ;;  %s648_s6 = sshll.u32 %s734_s4, 4  ;;  %s649_s6 = int_to_ptr.vmem [resolvable:$false] %s648_s6 }
  0x41   : > { %v231_v7 = vrot.slane %v230_v5, 2  ;;  %v237_v8 = vmax.f32 %v235_v4, %v236_v6  ;;  %v277_v24 = vrot.slane %v223_v22, %v276_v21  ;;  %v281_v25 = vrot.slane %v223_v22, %v280_v23  ;;  %p646_p0 = pnand %p645_p8, %p801_p9  ;;  %s650_s15 = scalar_lea.vmem %s649_s6, 256 }
  0x42   : > { %v316_v59 = vrot.slane %v312_v56, %v276_v21  ;;  %v320_v63 = vrot.slane %v312_v56, %v280_v23  ;;  %p651_p13 = scmp.lt.s32.totalorder %s379_s28, %s649_s6  ;;  %p652_p5 = scmp.lt.s32.totalorder %s650_s15, %s644_s30 }
  0x43   : > { %v232_v9 = vmax.f32 %v230_v5, %v231_v7  ;;  %v238_v10 = vrot.slane %v237_v8, 2  ;;  %vm282_vm1 = vcmp.eq.s32.totalorder %v878_v20, %v277_v24  ;;  %vm283_vm2 = vcmp.eq.s32.totalorder %v878_v20, %v281_v25  ;;  %p647_p3 = pneg %p646_p0 }
  0x44   : > { %v284_v30 = vsel %vm282_vm1, %v222_v0, 0.0  ;;  %v285_v34 = vsel %vm283_vm2, %v225_v1, 0.0  ;;  %vm321_vm4 = vcmp.ne.s32.totalorder %v316_v59, 0  ;;  %vm322_vm6 = vcmp.ne.s32.totalorder %v320_v63, 0  ;;  %p653_p12 = por %p652_p5, %p651_p13 }
  0x45   : > { %v233_v11 = vrot.slane %v232_v9, 1  ;;  %v239_v12 = vmax.f32 %v237_v8, %v238_v10  ;;  %v286_v35 = vsel %vm227_vm0, %v284_v30, 0.0  ;;  %v293_v38 = vsel %vm227_vm0, %v285_v34, 0.0 }
  0x46   : > { %v287_v41 = vrot.slane %v286_v35, 4  ;;  %v294_v44 = vrot.slane %v293_v38, 4  ;;  %v733_v7 = vmov 0.0   ;;  %p654_p6 = pnand %p653_p12, %p647_p3 }
  0x47   : > { %v234_v13 = vmax.f32 %v232_v9, %v233_v11  ;;  %v240_v14 = vrot.slane %v239_v12, 1  ;;  %v500_v8 = vsel %vm321_vm4, 1.0, %v733_v7  ;;  %v501_v9 = vsel %vm322_vm6, 1.0, %v733_v7 }
  0x48   : > { %v288_v47 = vadd.f32 %v287_v41, %v286_v35  ;;  %v295_v49 = vadd.f32 %v294_v44, %v293_v38 }
  0x49   : > { %v241_v15 = vmax.f32 %v239_v12, %v240_v14  ;;  %v344_v14 = vsel %vm327_vm5, %v500_v8, 0.0 }
  0x4a   : > { %v289_v50 = vrot.slane %v288_v47, 2  ;;  %v296_v51 = vrot.slane %v295_v49, 2 }
  0x4b   : > { %v244_v16 = vcombine.low %v234_v13, %v241_v15 }
  0x4c   : > { %v290_v52 = vadd.f32 %v289_v50, %v288_v47  ;;  %v297_v53 = vadd.f32 %v296_v51, %v295_v49 }
  0x4d   : > { %v246_v17 = vsub.f32 %v222_v0, %v244_v16  ;;  %v345_v16 = vsel %vm327_vm5, %v501_v9, 0.0 }
  0x4e   : > { %v291_v54 = vrot.slane %v290_v52, 1  ;;  %v298_v57 = vrot.slane %v297_v53, 1  ;;  %v346_v18 = vadd.f32 %v345_v16, %v344_v14 }
  0x4f   : > { %v247_v19 = vmul.f32 1.442695, %v246_v17 }
  0x50   : > { %v292_v61 = vadd.f32 %v291_v54, %v290_v52  ;;  %v299_v2 = vadd.f32 %v298_v57, %v297_v53 }
  0x51   : > { %582 = vpow2.f32 %v247_v19 }
  0x5e   : > { %v583_v26 = vpop.eup %582 }
  0x5f   : > { %v250_v27 = vcombine.high %v583_v26, %v583_v26  ;;  %v252_v28 = vsel %vm227_vm0, %v583_v26, 0.0 }
  0x60   : > { %v253_v29 = vrot.slane %v252_v28, 4 }
  0x61   : > { %v259_v31 = vsel %vm227_vm0, %v250_v27, 0.0 }
  0x62   : > { %v254_v32 = vadd.f32 %v253_v29, %v252_v28  ;;  %v260_v33 = vrot.slane %v259_v31, 4 }
  0x64   : > { %v255_v36 = vrot.slane %v254_v32, 2  ;;  %v261_v37 = vadd.f32 %v260_v33, %v259_v31 }
  0x66   : > { %v256_v39 = vadd.f32 %v255_v36, %v254_v32  ;;  %v262_v40 = vrot.slane %v261_v37, 2 }
  0x68   : > { %v257_v42 = vrot.slane %v256_v39, 1  ;;  %v263_v43 = vadd.f32 %v262_v40, %v261_v37 }
  0x6a   : > { %v258_v45 = vadd.f32 %v257_v42, %v256_v39  ;;  %v264_v46 = vrot.slane %v263_v43, 1 }
  0x6c   : > { %v265_v48 = vadd.f32 %v264_v46, %v263_v43  ;;  %584 = vlog2.f32 %v258_v45 }
  0x6e   : > { %586 = vlog2.f32 %v265_v48 }
  0x79   : > { %v585_v58 = vpop.eup %584 }
  0x7a   : > { %v267_v60 = vmul.f32 0.6931472, %v585_v58 }
  0x7b   : > { %v587_v62 = vpop.eup %586 }
  0x7c   : > { %v269_v0 = vmul.f32 0.6931472, %v587_v62  ;;  %v270_v1 = vadd.f32 %v267_v60, %v234_v13 }
  0x7e   : > { %v271_v3 = vadd.f32 %v269_v0, %v241_v15  ;;  %v300_v4 = vsub.f32 %v270_v1, %v292_v61 }
  0x80   : > { %v301_v5 = vsub.f32 %v271_v3, %v299_v2  ;;  %v325_v6 = vsel %vm321_vm4, %v300_v4, 0.0 }
  0x81   : > { %v328_v10 = vsel %vm327_vm5, %v325_v6, 0.0 }
  0x82   : > { %v326_v11 = vsel %vm322_vm6, %v301_v5, 0.0 }
  0x83   : > { %v329_v12 = vsel %vm327_vm5, %v326_v11, 0.0 }
  0x84   : > { %v330_v17 = vadd.f32 %v329_v12, %v328_v10 }
  0x86   : > { %331 = vadd.xlane.f32.xlu0 %v330_v17 }
  0x8a   : > { %347 = vadd.xlane.f32.xlu0 %v346_v18 }
 0x10f   : > { %v332_v13 = vpop.xlane.xlu0 %331 }
 0x110   : > { %v333_v15 = vrot.slane %v332_v13, 4 }
 0x112   : > { %v334_v19 = vadd.f32 %v333_v15, %v332_v13 }
 0x113   : > { %v348_v21 = vpop.xlane.xlu0 %347 }
 0x114   : > { %v335_v22 = vrot.slane %v334_v19, 2  ;;  %v349_v23 = vrot.slane %v348_v21, 4 }
 0x116   : > { %v350_v24 = vadd.f32 %v349_v23, %v348_v21  ;;  %v336_v25 = vadd.f32 %v335_v22, %v334_v19 }
 0x118   : > { %v351_v26 = vrot.slane %v350_v24, 2  ;;  %v337_v27 = vrot.slane %v336_v25, 1 }
 0x11a   : > { %v352_v28 = vadd.f32 %v351_v26, %v350_v24  ;;  %v338_v29 = vadd.f32 %v337_v27, %v336_v25 }
 0x11c   : > { %508 = vpush %v338_v29  ;;  %v353_v30 = vrot.slane %v352_v28, 1 }
 0x11e   : > { %v354_v31 = vadd.f32 %v353_v30, %v352_v28 }
 0x120   : > { %510 = vpush %v354_v31 }
 0x14d   : > { %s509_s26 = spop %508 }
 0x14e   : > { %v360_v33 = vstv %s509_s26 }
 0x151   : > { %s511_s29 = spop %510 }
 0x152   : > { %v358_v32 = vstv %s511_s29 }
 0x153   : > { %v359_v34 = vsel %vm357_vm7, %v358_v32, 0.0 }
 0x154   : > { %v361_v35 = vsel %vm356_vm8, %v360_v33, %v359_v34 }
 0x155   : > { %362 = vst [vmem:[%s219_s27] sm:$0xff] %v361_v35 }
 0x156   : > { %657 = shalt.err (!%p654_p6)
}
 0x157   : > { %s658_s16 = scalar_lea.hbm %s896_s8, 128  ;;  %s662_s5 = scalar_lea.hbm %s940_s2, 256 }
 0x158   : > { %p659_p7 = scmp.ne.s32.totalorder %s896_s8, %s658_s16  ;;  %p663_p4 = scmp.lt.s32.totalorder %s896_s8, %s940_s2 }
 0x159   : > { %p664_p10 = scmp.lt.s32.totalorder %s662_s5, %s658_s16 }
 0x15a   : > { %p660_p1 = pnand %p659_p7, %p801_p9 }
 0x15b   : > { %p665_p8 = por %p664_p10, %p663_p4 }
 0x15c   : > { %p661_p2 = pneg %p660_p1 }
 0x15e   : > { %p666_p0 = pnand %p665_p8, %p661_p2 }
 0x160   : > { %669 = shalt.err (!%p666_p0)
}
 0x161   : > { %516 = dma.vmem_to_hbm [thread:$0]  (%p801_p9), %s379_s28, 128, %s896_s8, %s364_s12  }
 0x162 PF: > { %s390_s21 = sand.u32 1, %s708_s9   ;;  %p947_p3 = scmp.ge.s32.totalorder %s728_s14, 2 }
 0x163   : > { %s391_s26 = scalar_lea.sflag [#allocation4], %s390_s21 }
 0x164   : > { %p526_p13 = pnand %p947_p3, %p808_p11 }
 0x166   : > { %p527_p5 = pneg %p526_p13 }
 0x168   : > { %703 = dma.done.wait (%p527_p5), %s391_s26, 128  }
 0x169   : > { %705 = vsyncadd (%p527_p5), %s391_s26, 4294967168  ;;  %s21_s14 = sadd.s32 1, %s728_s14   ;;  %s948_s9 = smov %s712_s10 }
 0x16a   : > { %p18_p12 = scmp.ge.s32.totalorder %s21_s14, 4   ;;  %s949_s10 = smov %s716_s11 }
 0x16b   : > { %s950_s11 = smov %s806_s23  ;;  %s951_s12 = smov %s724_s13 }
 0x16c   : > { %s952_s13 = smov %s954_s17  ;;  %20 = sbr.rel (!%p18_p12) target bundleno = 8 (0x8), region = 86 }
 0x171   :  { %396 = vsyncpa [#allocation3], 1 }
 0x172   :  { %398 = vsyncpa [#allocation3 + $0x1], 1 }
 0x173   :  { %399 = vsyncpa [#allocation6], 1 }
 0x174   :  { %401 = vsyncpa [#allocation6 + $0x1], 1 }
 0x175   :  { %402 = vsyncpa [#allocation4], 1 }
 0x176   :  { %404 = vsyncpa [#allocation4 + $0x1], 1 }

</bundles_post_ra>
